<compile_context>
chip_gen: v7x
topology: tpu7x:2x2x1
jax: 0.10.0
libtpu: 0.0.40
codegen_flags: <defaults>
</compile_context>

<pallas_src>
import functools
import math

import jax
import jax.numpy as jnp
from jax import lax
from jax.experimental import pallas as pl
from jax.experimental.pallas import tpu as pltpu


def _mha_kernel(q_ref, k_ref, v_ref, mask_ref,
                wq_ref, bq_ref, wk_ref, bk_ref, wv_ref, bv_ref,
                wo_ref, bo_ref,
                o_ref,
                x_scratch,
                *, h, d_k, scale):
    # Current batch element / query tile, promoted to f32 for compute.
    q_in = q_ref[0].astype(jnp.float32)        # (block_q, d_model)
    k_in = k_ref[0].astype(jnp.float32)        # (N, d_model)
    v_in = v_ref[0].astype(jnp.float32)        # (N, d_model)
    mask = mask_ref[0]                         # (block_q, N), 0 => masked out

    # Linear projections (weights pre-transposed on host: y = x @ W^T + b).
    q = jnp.dot(q_in, wq_ref[...], preferred_element_type=jnp.float32) + bq_ref[...]
    k = jnp.dot(k_in, wk_ref[...], preferred_element_type=jnp.float32) + bk_ref[...]
    v = jnp.dot(v_in, wv_ref[...], preferred_element_type=jnp.float32) + bv_ref[...]

    # Per-head scaled dot-product attention, statically unrolled (h is small).
    for i in range(h):
        lo = i * d_k
        qs = q[:, lo:lo + d_k]                 # (block_q, d_k)
        ks = k[:, lo:lo + d_k]                 # (N, d_k)
        vs = v[:, lo:lo + d_k]                 # (N, d_k)

        # scores = qs @ ks^T / sqrt(d_k)  (contract d_k, no explicit transpose)
        scores = lax.dot_general(
            qs, ks, (((1,), (1,)), ((), ())),
            preferred_element_type=jnp.float32) * scale
        scores = jnp.where(mask == 0, -1e9, scores)

        # Numerically-stable softmax; denominator via EUP reciprocal.
        m = jnp.max(scores, axis=-1, keepdims=True)
        e = jnp.exp(scores - m)
        denom = jnp.sum(e, axis=-1, keepdims=True)
        p = e * pl.reciprocal(denom, approx=False)

        x_scratch[:, lo:lo + d_k] = jnp.dot(
            p, vs, preferred_element_type=jnp.float32)

    # Output projection.
    out = jnp.dot(x_scratch[...], wo_ref[...],
                  preferred_element_type=jnp.float32) + bo_ref[...]
    o_ref[0] = out.astype(o_ref.dtype)


def multi_head_attention(query, key, value, params, h, mask=None,
                         max_block_q=128):
    """query: (B, K, d_model); key/value: (B, N, d_model); mask: (B, K, N) or None.

    params: dict with keys 'w_query','w_key','w_value','fc_out', each a tuple
    (W, b) with W of shape (d_model, d_model) in PyTorch (out, in) layout and
    b of shape (d_model,).  Returns (B, K, d_model), dtype of `query`.
    """
    B, Kq, d_model = query.shape
    N = key.shape[1]
    assert d_model % h == 0
    d_k = d_model // h
    scale = 1.0 / math.sqrt(d_k)

    if mask is None:
        mask = jnp.ones((B, Kq, N), dtype=jnp.float32)
    else:
        mask = mask.astype(jnp.float32)

    # Pre-transpose weights so the kernel computes x @ W^T as x @ W_t.
    (wq, bq) = params["w_query"]
    (wk, bk) = params["w_key"]
    (wv, bv) = params["w_value"]
    (wo, bo) = params["fc_out"]
    wq_t, wk_t, wv_t, wo_t = wq.T, wk.T, wv.T, wo.T
    bq2, bk2, bv2, bo2 = (b.reshape(1, d_model) for b in (bq, bk, bv, bo))

    block_q = Kq if Kq <= max_block_q else max_block_q
    grid = (B, pl.cdiv(Kq, block_q))

    kernel = functools.partial(_mha_kernel, h=h, d_k=d_k, scale=scale)

    w_spec = pl.BlockSpec((d_model, d_model), lambda b, qb: (0, 0))
    b_spec = pl.BlockSpec((1, d_model), lambda b, qb: (0, 0))

    out = pl.pallas_call(
        kernel,
        out_shape=jax.ShapeDtypeStruct((B, Kq, d_model), query.dtype),
        grid_spec=pltpu.PrefetchScalarGridSpec(
            num_scalar_prefetch=0,
            grid=grid,
            in_specs=[
                pl.BlockSpec((1, block_q, d_model), lambda b, qb: (b, qb, 0)),  # q
                pl.BlockSpec((1, N, d_model), lambda b, qb: (b, 0, 0)),         # k
                pl.BlockSpec((1, N, d_model), lambda b, qb: (b, 0, 0)),         # v
                pl.BlockSpec((1, block_q, N), lambda b, qb: (b, qb, 0)),        # mask
                w_spec, b_spec,   # w_query
                w_spec, b_spec,   # w_key
                w_spec, b_spec,   # w_value
                w_spec, b_spec,   # fc_out
            ],
            out_specs=pl.BlockSpec((1, block_q, d_model),
                                   lambda b, qb: (b, qb, 0)),
            scratch_shapes=[pltpu.VMEM((block_q, d_model), jnp.float32)],
        ),
        compiler_params=pltpu.CompilerParams(
            dimension_semantics=("parallel", "parallel")),
    )(query, key, value, mask,
      wq_t, bq2, wk_t, bk2, wv_t, bv2, wo_t, bo2)

    return out


if __name__ == "__main__":
    key0 = jax.random.PRNGKey(0)
    B, S, d_model, h = 2, 8, 32, 4   # query len = kv len = 8
    d_k = d_model // h

    ks = jax.random.split(key0, 12)
    query = jax.random.normal(ks[0], (B, S, d_model), dtype=jnp.float32)
    keyx = jax.random.normal(ks[1], (B, S, d_model), dtype=jnp.float32)
    value = jax.random.normal(ks[2], (B, S, d_model), dtype=jnp.float32)

    def make_linear(kw, kb):
        w = 0.1 * jax.random.normal(kw, (d_model, d_model), dtype=jnp.float32)
        b = 0.1 * jax.random.normal(kb, (d_model,), dtype=jnp.float32)
        return w, b

    params = {
        "w_query": make_linear(ks[3], ks[4]),
        "w_key": make_linear(ks[5], ks[6]),
        "w_value": make_linear(ks[7], ks[8]),
        "fc_out": make_linear(ks[9], ks[10]),
    }

    mask = jax.random.bernoulli(ks[11], 0.7, (B, S, S)).astype(jnp.float32)
    mask = mask.at[:, :, 0].set(1.0)   # keep at least one valid key per row

    out = multi_head_attention(query, keyx, value, params, h, mask=mask)
    jax.block_until_ready(out)

    # ---- pure-JAX reference (eval mode: dropout = identity) ----
    def linear(x, wb):
        w, b = wb
        return x @ w.T + b

    qp = linear(query, params["w_query"]).reshape(B, S, h, d_k).transpose(0, 2, 1, 3)
    kp = linear(keyx, params["w_key"]).reshape(B, S, h, d_k).transpose(0, 2, 1, 3)
    vp = linear(value, params["w_value"]).reshape(B, S, h, d_k).transpose(0, 2, 1, 3)
    scores = jnp.einsum("bhqd,bhkd->bhqk", qp, kp) / math.sqrt(d_k)
    scores = jnp.where(mask[:, None, :, :] == 0, -1e9, scores)
    attn = jax.nn.softmax(scores, axis=-1)
    xr = jnp.einsum("bhqk,bhkd->bhqd", attn, vp).transpose(0, 2, 1, 3)
    xr = xr.reshape(B, S, d_model)
    ref = linear(xr, params["fc_out"])

    assert jnp.allclose(out, ref, atol=1e-4, rtol=1e-4), (
        f"max abs err {jnp.max(jnp.abs(out - ref))}")
    print("KERNEL_OK")
</pallas_src>

<mosaic_0001>
module attributes {stable_mosaic.version = 11 : i64} {
  func.func @_mha_kernel(%arg0: i32, %arg1: i32, %arg2: memref<1x8x32xf32, #tpu.memory_space<vmem>>, %arg3: memref<1x8x32xf32, #tpu.memory_space<vmem>>, %arg4: memref<1x8x32xf32, #tpu.memory_space<vmem>>, %arg5: memref<1x8x8xf32, #tpu.memory_space<vmem>>, %arg6: memref<32x32xf32, #tpu.memory_space<vmem>>, %arg7: memref<1x32xf32, #tpu.memory_space<vmem>>, %arg8: memref<32x32xf32, #tpu.memory_space<vmem>>, %arg9: memref<1x32xf32, #tpu.memory_space<vmem>>, %arg10: memref<32x32xf32, #tpu.memory_space<vmem>>, %arg11: memref<1x32xf32, #tpu.memory_space<vmem>>, %arg12: memref<32x32xf32, #tpu.memory_space<vmem>>, %arg13: memref<1x32xf32, #tpu.memory_space<vmem>>, %arg14: memref<1x8x32xf32, #tpu.memory_space<vmem>>, %arg15: memref<8x32xf32, #tpu.memory_space<vmem>>) attributes {dimension_semantics = [#tpu.dimension_semantics<parallel>, #tpu.dimension_semantics<parallel>], iteration_bounds = array<i64: 2, 1>, scalar_prefetch = 0 : i64, scratch_operands = 1 : i64, tpu.core_type = #tpu.core_type<tc>, window_params = [{transform_indices = @transform_0, window_bounds = array<i64: 1, 8, 32>}, {transform_indices = @transform_1, window_bounds = array<i64: 1, 8, 32>}, {transform_indices = @transform_2, window_bounds = array<i64: 1, 8, 32>}, {transform_indices = @transform_3, window_bounds = array<i64: 1, 8, 8>}, {pipeline_mode = #tpu.pipeline_mode<synchronous>, transform_indices = @transform_4, window_bounds = array<i64: 32, 32>}, {pipeline_mode = #tpu.pipeline_mode<synchronous>, transform_indices = @transform_5, window_bounds = array<i64: 1, 32>}, {pipeline_mode = #tpu.pipeline_mode<synchronous>, transform_indices = @transform_6, window_bounds = array<i64: 32, 32>}, {pipeline_mode = #tpu.pipeline_mode<synchronous>, transform_indices = @transform_7, window_bounds = array<i64: 1, 32>}, {pipeline_mode = #tpu.pipeline_mode<synchronous>, transform_indices = @transform_8, window_bounds = array<i64: 32, 32>}, {pipeline_mode = #tpu.pipeline_mode<synchronous>, transform_indices = @transform_9, window_bounds = array<i64: 1, 32>}, {pipeline_mode = #tpu.pipeline_mode<synchronous>, transform_indices = @transform_10, window_bounds = array<i64: 32, 32>}, {pipeline_mode = #tpu.pipeline_mode<synchronous>, transform_indices = @transform_11, window_bounds = array<i64: 1, 32>}, {transform_indices = @transform_12, window_bounds = array<i64: 1, 8, 32>}]} {
    %c0 = arith.constant 0 : index
    %c0_0 = arith.constant 0 : index
    %c0_1 = arith.constant 0 : index
    %0 = vector.load %arg2[%c0, %c0_0, %c0_1] : memref<1x8x32xf32, #tpu.memory_space<vmem>>, vector<1x8x32xf32>
    %1 = vector.shape_cast %0 : vector<1x8x32xf32> to vector<8x32xf32>
    %c0_2 = arith.constant 0 : index
    %c0_3 = arith.constant 0 : index
    %c0_4 = arith.constant 0 : index
    %2 = vector.load %arg3[%c0_2, %c0_3, %c0_4] : memref<1x8x32xf32, #tpu.memory_space<vmem>>, vector<1x8x32xf32>
    %3 = vector.shape_cast %2 : vector<1x8x32xf32> to vector<8x32xf32>
    %c0_5 = arith.constant 0 : index
    %c0_6 = arith.constant 0 : index
    %c0_7 = arith.constant 0 : index
    %4 = vector.load %arg4[%c0_5, %c0_6, %c0_7] : memref<1x8x32xf32, #tpu.memory_space<vmem>>, vector<1x8x32xf32>
    %5 = vector.shape_cast %4 : vector<1x8x32xf32> to vector<8x32xf32>
    %c0_8 = arith.constant 0 : index
    %c0_9 = arith.constant 0 : index
    %c0_10 = arith.constant 0 : index
    %6 = vector.load %arg5[%c0_8, %c0_9, %c0_10] : memref<1x8x8xf32, #tpu.memory_space<vmem>>, vector<1x8x8xf32>
    %7 = vector.shape_cast %6 : vector<1x8x8xf32> to vector<8x8xf32>
    %c0_11 = arith.constant 0 : index
    %c0_12 = arith.constant 0 : index
    %8 = vector.load %arg6[%c0_11, %c0_12] : memref<32x32xf32, #tpu.memory_space<vmem>>, vector<32x32xf32>
    %cst = arith.constant dense<0.000000e+00> : vector<8x32xf32>
    %9 = tpu.matmul %1, %8, %cst {dimension_numbers = #tpu.dot_dimension_numbers<[1], [0], [0], [1], [0, 0, 1, 1], [], []>} : vector<8x32xf32>, vector<32x32xf32>, vector<8x32xf32> -> vector<8x32xf32>
    %c0_13 = arith.constant 0 : index
    %c0_14 = arith.constant 0 : index
    %10 = vector.load %arg7[%c0_13, %c0_14] : memref<1x32xf32, #tpu.memory_space<vmem>>, vector<1x32xf32>
    %11 = vector.broadcast %10 : vector<1x32xf32> to vector<8x32xf32>
    %12 = arith.addf %9, %11 : vector<8x32xf32>
    %c0_15 = arith.constant 0 : index
    %c0_16 = arith.constant 0 : index
    %13 = vector.load %arg8[%c0_15, %c0_16] : memref<32x32xf32, #tpu.memory_space<vmem>>, vector<32x32xf32>
    %cst_17 = arith.constant dense<0.000000e+00> : vector<8x32xf32>
    %14 = tpu.matmul %3, %13, %cst_17 {dimension_numbers = #tpu.dot_dimension_numbers<[1], [0], [0], [1], [0, 0, 1, 1], [], []>} : vector<8x32xf32>, vector<32x32xf32>, vector<8x32xf32> -> vector<8x32xf32>
    %c0_18 = arith.constant 0 : index
    %c0_19 = arith.constant 0 : index
    %15 = vector.load %arg9[%c0_18, %c0_19] : memref<1x32xf32, #tpu.memory_space<vmem>>, vector<1x32xf32>
    %16 = vector.broadcast %15 : vector<1x32xf32> to vector<8x32xf32>
    %17 = arith.addf %14, %16 : vector<8x32xf32>
    %c0_20 = arith.constant 0 : index
    %c0_21 = arith.constant 0 : index
    %18 = vector.load %arg10[%c0_20, %c0_21] : memref<32x32xf32, #tpu.memory_space<vmem>>, vector<32x32xf32>
    %cst_22 = arith.constant dense<0.000000e+00> : vector<8x32xf32>
    %19 = tpu.matmul %5, %18, %cst_22 {dimension_numbers = #tpu.dot_dimension_numbers<[1], [0], [0], [1], [0, 0, 1, 1], [], []>} : vector<8x32xf32>, vector<32x32xf32>, vector<8x32xf32> -> vector<8x32xf32>
    %c0_23 = arith.constant 0 : index
    %c0_24 = arith.constant 0 : index
    %20 = vector.load %arg11[%c0_23, %c0_24] : memref<1x32xf32, #tpu.memory_space<vmem>>, vector<1x32xf32>
    %21 = vector.broadcast %20 : vector<1x32xf32> to vector<8x32xf32>
    %22 = arith.addf %19, %21 : vector<8x32xf32>
    %23 = vector.extract_strided_slice %12 {offsets = [0, 0], sizes = [8, 8], strides = [1, 1]} : vector<8x32xf32> to vector<8x8xf32>
    %24 = vector.extract_strided_slice %17 {offsets = [0, 0], sizes = [8, 8], strides = [1, 1]} : vector<8x32xf32> to vector<8x8xf32>
    %25 = vector.extract_strided_slice %22 {offsets = [0, 0], sizes = [8, 8], strides = [1, 1]} : vector<8x32xf32> to vector<8x8xf32>
    %cst_25 = arith.constant dense<0.000000e+00> : vector<8x8xf32>
    %26 = tpu.matmul %23, %24, %cst_25 {dimension_numbers = #tpu.dot_dimension_numbers<[1], [1], [0], [0], [0, 0, 1, 0], [], []>} : vector<8x8xf32>, vector<8x8xf32>, vector<8x8xf32> -> vector<8x8xf32>
    %cst_26 = arith.constant 0.353553385 : f32
    %27 = vector.broadcast %cst_26 : f32 to vector<8x8xf32>
    %28 = arith.mulf %26, %27 : vector<8x8xf32>
    %cst_27 = arith.constant 0.000000e+00 : f32
    %29 = vector.broadcast %cst_27 : f32 to vector<8x8xf32>
    %30 = arith.cmpf oeq, %7, %29 : vector<8x8xf32>
    %cst_28 = arith.constant -1.000000e+09 : f32
    %31 = vector.broadcast %cst_28 : f32 to vector<8x8xf32>
    %32 = arith.select %30, %31, %28 : vector<8x8xi1>, vector<8x8xf32>
    %cst_29 = arith.constant dense<0xFF800000> : vector<8xf32>
    %33 = vector.multi_reduction <maximumf>, %32, %cst_29 [1] : vector<8x8xf32> to vector<8xf32>
    %34 = vector.shape_cast %33 : vector<8xf32> to vector<8x1xf32>
    %35 = vector.broadcast %34 : vector<8x1xf32> to vector<8x8xf32>
    %36 = arith.subf %32, %35 : vector<8x8xf32>
    %37 = math.exp %36 : vector<8x8xf32>
    %cst_30 = arith.constant dense<0.000000e+00> : vector<8xf32>
    %38 = vector.multi_reduction <add>, %37, %cst_30 [1] : vector<8x8xf32> to vector<8xf32>
    %39 = vector.shape_cast %38 : vector<8xf32> to vector<8x1xf32>
    %40 = tpu.reciprocal %39 : vector<8x1xf32> -> vector<8x1xf32>
    %41 = vector.broadcast %40 : vector<8x1xf32> to vector<8x8xf32>
    %42 = arith.mulf %37, %41 : vector<8x8xf32>
    %cst_31 = arith.constant dense<0.000000e+00> : vector<8x8xf32>
    %43 = tpu.matmul %42, %25, %cst_31 {dimension_numbers = #tpu.dot_dimension_numbers<[1], [0], [0], [1], [0, 0, 1, 1], [], []>} : vector<8x8xf32>, vector<8x8xf32>, vector<8x8xf32> -> vector<8x8xf32>
    %c0_32 = arith.constant 0 : index
    %c0_33 = arith.constant 0 : index
    %44 = vector.load %arg15[%c0_32, %c0_33] : memref<8x32xf32, #tpu.memory_space<vmem>>, vector<8x8xf32>
    tpu.vector_store %arg15[%c0_32, %c0_33], %43 {strides = array<i32>} : memref<8x32xf32, #tpu.memory_space<vmem>>, vector<8x8xf32>,
    %45 = vector.extract_strided_slice %12 {offsets = [0, 8], sizes = [8, 8], strides = [1, 1]} : vector<8x32xf32> to vector<8x8xf32>
    %46 = vector.extract_strided_slice %17 {offsets = [0, 8], sizes = [8, 8], strides = [1, 1]} : vector<8x32xf32> to vector<8x8xf32>
    %47 = vector.extract_strided_slice %22 {offsets = [0, 8], sizes = [8, 8], strides = [1, 1]} : vector<8x32xf32> to vector<8x8xf32>
    %cst_34 = arith.constant dense<0.000000e+00> : vector<8x8xf32>
    %48 = tpu.matmul %45, %46, %cst_34 {dimension_numbers = #tpu.dot_dimension_numbers<[1], [1], [0], [0], [0, 0, 1, 0], [], []>} : vector<8x8xf32>, vector<8x8xf32>, vector<8x8xf32> -> vector<8x8xf32>
    %cst_35 = arith.constant 0.353553385 : f32
    %49 = vector.broadcast %cst_35 : f32 to vector<8x8xf32>
    %50 = arith.mulf %48, %49 : vector<8x8xf32>
    %cst_36 = arith.constant 0.000000e+00 : f32
    %51 = vector.broadcast %cst_36 : f32 to vector<8x8xf32>
    %52 = arith.cmpf oeq, %7, %51 : vector<8x8xf32>
    %cst_37 = arith.constant -1.000000e+09 : f32
    %53 = vector.broadcast %cst_37 : f32 to vector<8x8xf32>
    %54 = arith.select %52, %53, %50 : vector<8x8xi1>, vector<8x8xf32>
    %cst_38 = arith.constant dense<0xFF800000> : vector<8xf32>
    %55 = vector.multi_reduction <maximumf>, %54, %cst_38 [1] : vector<8x8xf32> to vector<8xf32>
    %56 = vector.shape_cast %55 : vector<8xf32> to vector<8x1xf32>
    %57 = vector.broadcast %56 : vector<8x1xf32> to vector<8x8xf32>
    %58 = arith.subf %54, %57 : vector<8x8xf32>
    %59 = math.exp %58 : vector<8x8xf32>
    %cst_39 = arith.constant dense<0.000000e+00> : vector<8xf32>
    %60 = vector.multi_reduction <add>, %59, %cst_39 [1] : vector<8x8xf32> to vector<8xf32>
    %61 = vector.shape_cast %60 : vector<8xf32> to vector<8x1xf32>
    %62 = tpu.reciprocal %61 : vector<8x1xf32> -> vector<8x1xf32>
    %63 = vector.broadcast %62 : vector<8x1xf32> to vector<8x8xf32>
    %64 = arith.mulf %59, %63 : vector<8x8xf32>
    %cst_40 = arith.constant dense<0.000000e+00> : vector<8x8xf32>
    %65 = tpu.matmul %64, %47, %cst_40 {dimension_numbers = #tpu.dot_dimension_numbers<[1], [0], [0], [1], [0, 0, 1, 1], [], []>} : vector<8x8xf32>, vector<8x8xf32>, vector<8x8xf32> -> vector<8x8xf32>
    %c0_41 = arith.constant 0 : index
    %c8 = arith.constant 8 : index
    %66 = vector.load %arg15[%c0_41, %c8] : memref<8x32xf32, #tpu.memory_space<vmem>>, vector<8x8xf32>
    tpu.vector_store %arg15[%c0_41, %c8], %65 {strides = array<i32>} : memref<8x32xf32, #tpu.memory_space<vmem>>, vector<8x8xf32>,
    %67 = vector.extract_strided_slice %12 {offsets = [0, 16], sizes = [8, 8], strides = [1, 1]} : vector<8x32xf32> to vector<8x8xf32>
    %68 = vector.extract_strided_slice %17 {offsets = [0, 16], sizes = [8, 8], strides = [1, 1]} : vector<8x32xf32> to vector<8x8xf32>
    %69 = vector.extract_strided_slice %22 {offsets = [0, 16], sizes = [8, 8], strides = [1, 1]} : vector<8x32xf32> to vector<8x8xf32>
    %cst_42 = arith.constant dense<0.000000e+00> : vector<8x8xf32>
    %70 = tpu.matmul %67, %68, %cst_42 {dimension_numbers = #tpu.dot_dimension_numbers<[1], [1], [0], [0], [0, 0, 1, 0], [], []>} : vector<8x8xf32>, vector<8x8xf32>, vector<8x8xf32> -> vector<8x8xf32>
    %cst_43 = arith.constant 0.353553385 : f32
    %71 = vector.broadcast %cst_43 : f32 to vector<8x8xf32>
    %72 = arith.mulf %70, %71 : vector<8x8xf32>
    %cst_44 = arith.constant 0.000000e+00 : f32
    %73 = vector.broadcast %cst_44 : f32 to vector<8x8xf32>
    %74 = arith.cmpf oeq, %7, %73 : vector<8x8xf32>
    %cst_45 = arith.constant -1.000000e+09 : f32
    %75 = vector.broadcast %cst_45 : f32 to vector<8x8xf32>
    %76 = arith.select %74, %75, %72 : vector<8x8xi1>, vector<8x8xf32>
    %cst_46 = arith.constant dense<0xFF800000> : vector<8xf32>
    %77 = vector.multi_reduction <maximumf>, %76, %cst_46 [1] : vector<8x8xf32> to vector<8xf32>
    %78 = vector.shape_cast %77 : vector<8xf32> to vector<8x1xf32>
    %79 = vector.broadcast %78 : vector<8x1xf32> to vector<8x8xf32>
    %80 = arith.subf %76, %79 : vector<8x8xf32>
    %81 = math.exp %80 : vector<8x8xf32>
    %cst_47 = arith.constant dense<0.000000e+00> : vector<8xf32>
    %82 = vector.multi_reduction <add>, %81, %cst_47 [1] : vector<8x8xf32> to vector<8xf32>
    %83 = vector.shape_cast %82 : vector<8xf32> to vector<8x1xf32>
    %84 = tpu.reciprocal %83 : vector<8x1xf32> -> vector<8x1xf32>
    %85 = vector.broadcast %84 : vector<8x1xf32> to vector<8x8xf32>
    %86 = arith.mulf %81, %85 : vector<8x8xf32>
    %cst_48 = arith.constant dense<0.000000e+00> : vector<8x8xf32>
    %87 = tpu.matmul %86, %69, %cst_48 {dimension_numbers = #tpu.dot_dimension_numbers<[1], [0], [0], [1], [0, 0, 1, 1], [], []>} : vector<8x8xf32>, vector<8x8xf32>, vector<8x8xf32> -> vector<8x8xf32>
    %c0_49 = arith.constant 0 : index
    %c16 = arith.constant 16 : index
    %88 = vector.load %arg15[%c0_49, %c16] : memref<8x32xf32, #tpu.memory_space<vmem>>, vector<8x8xf32>
    tpu.vector_store %arg15[%c0_49, %c16], %87 {strides = array<i32>} : memref<8x32xf32, #tpu.memory_space<vmem>>, vector<8x8xf32>,
    %89 = vector.extract_strided_slice %12 {offsets = [0, 24], sizes = [8, 8], strides = [1, 1]} : vector<8x32xf32> to vector<8x8xf32>
    %90 = vector.extract_strided_slice %17 {offsets = [0, 24], sizes = [8, 8], strides = [1, 1]} : vector<8x32xf32> to vector<8x8xf32>
    %91 = vector.extract_strided_slice %22 {offsets = [0, 24], sizes = [8, 8], strides = [1, 1]} : vector<8x32xf32> to vector<8x8xf32>
    %cst_50 = arith.constant dense<0.000000e+00> : vector<8x8xf32>
    %92 = tpu.matmul %89, %90, %cst_50 {dimension_numbers = #tpu.dot_dimension_numbers<[1], [1], [0], [0], [0, 0, 1, 0], [], []>} : vector<8x8xf32>, vector<8x8xf32>, vector<8x8xf32> -> vector<8x8xf32>
    %cst_51 = arith.constant 0.353553385 : f32
    %93 = vector.broadcast %cst_51 : f32 to vector<8x8xf32>
    %94 = arith.mulf %92, %93 : vector<8x8xf32>
    %cst_52 = arith.constant 0.000000e+00 : f32
    %95 = vector.broadcast %cst_52 : f32 to vector<8x8xf32>
    %96 = arith.cmpf oeq, %7, %95 : vector<8x8xf32>
    %cst_53 = arith.constant -1.000000e+09 : f32
    %97 = vector.broadcast %cst_53 : f32 to vector<8x8xf32>
    %98 = arith.select %96, %97, %94 : vector<8x8xi1>, vector<8x8xf32>
    %cst_54 = arith.constant dense<0xFF800000> : vector<8xf32>
    %99 = vector.multi_reduction <maximumf>, %98, %cst_54 [1] : vector<8x8xf32> to vector<8xf32>
    %100 = vector.shape_cast %99 : vector<8xf32> to vector<8x1xf32>
    %101 = vector.broadcast %100 : vector<8x1xf32> to vector<8x8xf32>
    %102 = arith.subf %98, %101 : vector<8x8xf32>
    %103 = math.exp %102 : vector<8x8xf32>
    %cst_55 = arith.constant dense<0.000000e+00> : vector<8xf32>
    %104 = vector.multi_reduction <add>, %103, %cst_55 [1] : vector<8x8xf32> to vector<8xf32>
    %105 = vector.shape_cast %104 : vector<8xf32> to vector<8x1xf32>
    %106 = tpu.reciprocal %105 : vector<8x1xf32> -> vector<8x1xf32>
    %107 = vector.broadcast %106 : vector<8x1xf32> to vector<8x8xf32>
    %108 = arith.mulf %103, %107 : vector<8x8xf32>
    %cst_56 = arith.constant dense<0.000000e+00> : vector<8x8xf32>
    %109 = tpu.matmul %108, %91, %cst_56 {dimension_numbers = #tpu.dot_dimension_numbers<[1], [0], [0], [1], [0, 0, 1, 1], [], []>} : vector<8x8xf32>, vector<8x8xf32>, vector<8x8xf32> -> vector<8x8xf32>
    %c0_57 = arith.constant 0 : index
    %c24 = arith.constant 24 : index
    %110 = vector.load %arg15[%c0_57, %c24] : memref<8x32xf32, #tpu.memory_space<vmem>>, vector<8x8xf32>
    tpu.vector_store %arg15[%c0_57, %c24], %109 {strides = array<i32>} : memref<8x32xf32, #tpu.memory_space<vmem>>, vector<8x8xf32>,
    %c0_58 = arith.constant 0 : index
    %c0_59 = arith.constant 0 : index
    %111 = vector.load %arg15[%c0_58, %c0_59] : memref<8x32xf32, #tpu.memory_space<vmem>>, vector<8x32xf32>
    %c0_60 = arith.constant 0 : index
    %c0_61 = arith.constant 0 : index
    %112 = vector.load %arg12[%c0_60, %c0_61] : memref<32x32xf32, #tpu.memory_space<vmem>>, vector<32x32xf32>
    %cst_62 = arith.constant dense<0.000000e+00> : vector<8x32xf32>
    %113 = tpu.matmul %111, %112, %cst_62 {dimension_numbers = #tpu.dot_dimension_numbers<[1], [0], [0], [1], [0, 0, 1, 1], [], []>} : vector<8x32xf32>, vector<32x32xf32>, vector<8x32xf32> -> vector<8x32xf32>
    %c0_63 = arith.constant 0 : index
    %c0_64 = arith.constant 0 : index
    %114 = vector.load %arg13[%c0_63, %c0_64] : memref<1x32xf32, #tpu.memory_space<vmem>>, vector<1x32xf32>
    %115 = vector.broadcast %114 : vector<1x32xf32> to vector<8x32xf32>
    %116 = arith.addf %113, %115 : vector<8x32xf32>
    %c0_65 = arith.constant 0 : index
    %c0_66 = arith.constant 0 : index
    %c0_67 = arith.constant 0 : index
    %117 = vector.load %arg14[%c0_65, %c0_66, %c0_67] : memref<1x8x32xf32, #tpu.memory_space<vmem>>, vector<1x8x32xf32>
    %118 = vector.shape_cast %117 : vector<1x8x32xf32> to vector<8x32xf32>
    %119 = vector.shape_cast %116 : vector<8x32xf32> to vector<1x8x32xf32>
    tpu.vector_store %arg14[%c0_65, %c0_66, %c0_67], %119 {strides = array<i32>} : memref<1x8x32xf32, #tpu.memory_space<vmem>>, vector<1x8x32xf32>,
    return
  }
  func.func @transform_0(%arg0: i32, %arg1: i32) -> (i32, i32, i32) {
    %c0_i32 = arith.constant 0 : i32
    %c0_i32_0 = arith.constant 0 : i32
    return %arg0, %arg1, %c0_i32 : i32, i32, i32
  }
  func.func @transform_1(%arg0: i32, %arg1: i32) -> (i32, i32, i32) {
    %c0_i32 = arith.constant 0 : i32
    %c0_i32_0 = arith.constant 0 : i32
    %c0_i32_1 = arith.constant 0 : i32
    return %arg0, %c0_i32, %c0_i32_0 : i32, i32, i32
  }
  func.func @transform_2(%arg0: i32, %arg1: i32) -> (i32, i32, i32) {
    %c0_i32 = arith.constant 0 : i32
    %c0_i32_0 = arith.constant 0 : i32
    %c0_i32_1 = arith.constant 0 : i32
    return %arg0, %c0_i32, %c0_i32_0 : i32, i32, i32
  }
  func.func @transform_3(%arg0: i32, %arg1: i32) -> (i32, i32, i32) {
    %c0_i32 = arith.constant 0 : i32
    %c0_i32_0 = arith.constant 0 : i32
    return %arg0, %arg1, %c0_i32 : i32, i32, i32
  }
  func.func @transform_4(%arg0: i32, %arg1: i32) -> (i32, i32) {
    %c0_i32 = arith.constant 0 : i32
    %c0_i32_0 = arith.constant 0 : i32
    %c0_i32_1 = arith.constant 0 : i32
    return %c0_i32, %c0_i32_0 : i32, i32
  }
  func.func @transform_5(%arg0: i32, %arg1: i32) -> (i32, i32) {
    %c0_i32 = arith.constant 0 : i32
    %c0_i32_0 = arith.constant 0 : i32
    %c0_i32_1 = arith.constant 0 : i32
    return %c0_i32, %c0_i32_0 : i32, i32
  }
  func.func @transform_6(%arg0: i32, %arg1: i32) -> (i32, i32) {
    %c0_i32 = arith.constant 0 : i32
    %c0_i32_0 = arith.constant 0 : i32
    %c0_i32_1 = arith.constant 0 : i32
    return %c0_i32, %c0_i32_0 : i32, i32
  }
  func.func @transform_7(%arg0: i32, %arg1: i32) -> (i32, i32) {
    %c0_i32 = arith.constant 0 : i32
    %c0_i32_0 = arith.constant 0 : i32
    %c0_i32_1 = arith.constant 0 : i32
    return %c0_i32, %c0_i32_0 : i32, i32
  }
  func.func @transform_8(%arg0: i32, %arg1: i32) -> (i32, i32) {
    %c0_i32 = arith.constant 0 : i32
    %c0_i32_0 = arith.constant 0 : i32
    %c0_i32_1 = arith.constant 0 : i32
    return %c0_i32, %c0_i32_0 : i32, i32
  }
  func.func @transform_9(%arg0: i32, %arg1: i32) -> (i32, i32) {
    %c0_i32 = arith.constant 0 : i32
    %c0_i32_0 = arith.constant 0 : i32
    %c0_i32_1 = arith.constant 0 : i32
    return %c0_i32, %c0_i32_0 : i32, i32
  }
  func.func @transform_10(%arg0: i32, %arg1: i32) -> (i32, i32) {
    %c0_i32 = arith.constant 0 : i32
    %c0_i32_0 = arith.constant 0 : i32
    %c0_i32_1 = arith.constant 0 : i32
    return %c0_i32, %c0_i32_0 : i32, i32
  }
  func.func @transform_11(%arg0: i32, %arg1: i32) -> (i32, i32) {
    %c0_i32 = arith.constant 0 : i32
    %c0_i32_0 = arith.constant 0 : i32
    %c0_i32_1 = arith.constant 0 : i32
    return %c0_i32, %c0_i32_0 : i32, i32
  }
  func.func @transform_12(%arg0: i32, %arg1: i32) -> (i32, i32, i32) {
    %c0_i32 = arith.constant 0 : i32
    %c0_i32_0 = arith.constant 0 : i32
    return %arg0, %arg1, %c0_i32 : i32, i32, i32
  }
}

</mosaic_0001>

<bundles_post_ra>
// kernel: tpu_custom_call.1
= control target key start
LH: loop header
LB: loop body
LE: loop exit
PB: predicated region body
PF: predicated region fallthrough
CT: control target
= control target key end

     0   :  { %s3047_s0 = inlined_call_operand.hbm [shape: f32[2,8,32], index: 0, kind: input, shape index: {}]   ;;  %s3048_s1 = inlined_call_operand.hbm [shape: f32[2,8,32], index: 1, kind: input, shape index: {}]   ;;  %s3049_s2 = inlined_call_operand.hbm [shape: f32[2,8,32], index: 2, kind: input, shape index: {}]   ;;  %s3050_s3 = inlined_call_operand.hbm [shape: f32[2,8,8], index: 3, kind: input, shape index: {}]   ;;  %s3051_s4 = inlined_call_operand.hbm [shape: f32[32,32], index: 4, kind: input, shape index: {}]   ;;  %s3052_s5 = inlined_call_operand.vmem [shape: f32[1,32], index: 5, kind: input, shape index: {}]   ;;  %s3053_s6 = inlined_call_operand.hbm [shape: f32[32,32], index: 6, kind: input, shape index: {}]   ;;  %s3054_s7 = inlined_call_operand.vmem [shape: f32[1,32], index: 7, kind: input, shape index: {}]   ;;  %s3055_s8 = inlined_call_operand.hbm [shape: f32[32,32], index: 8, kind: input, shape index: {}]   ;;  %s3056_s9 = inlined_call_operand.vmem [shape: f32[1,32], index: 9, kind: input, shape index: {}]   ;;  %s3057_s10 = inlined_call_operand.vmem [shape: f32[32,32], index: 10, kind: input, shape index: {}]   ;;  %s3058_s11 = inlined_call_operand.vmem [shape: f32[1,32], index: 11, kind: input, shape index: {}]   ;;  %s3059_s12 = inlined_call_operand.hbm [shape: f32[2,8,32], index: 12, kind: output, shape index: {}]  }
   0x1   :  { %3081 = sst [smem:[#allocation29_spill]] %s3047_s0 }
   0x2   :  { %3082 = sst [smem:[#allocation30_spill]] %s3048_s1 }
   0x3   :  { %3083 = sst [smem:[#allocation31_spill]] %s3051_s4 }
   0x4   :  { %3084 = sst [smem:[#allocation32_spill]] %s3053_s6 }
   0x5   :  { %3085 = sst [smem:[#allocation33_spill]] %s3056_s9 }
   0x6   :  { %3086 = sst [smem:[#allocation34_spill]] %s3057_s10 }
   0x7   :  { %3087 = sst [smem:[#allocation35_spill]] %s3058_s11 }
   0x8   :  { %3088 = sst [smem:[#allocation36_spill]] %s3059_s12 }
   0x9   :  { %17 = vsyncpa [#allocation4], 0 }
   0xa   :  { %19 = vsyncpa [#allocation4 + $0x1], 0 }
   0xb   :  { %20 = vsyncpa [#allocation7], 0 }
   0xc   :  { %22 = vsyncpa [#allocation7 + $0x1], 0 }
   0xd   :  { %23 = vsyncpa [#allocation10], 0 }
   0xe   :  { %25 = vsyncpa [#allocation10 + $0x1], 0 }
   0xf   :  { %26 = vsyncpa [#allocation13], 0 }
  0x10   :  { %27 = vsyncpa [#allocation5], 0 }
  0x11   :  { %29 = vsyncpa [#allocation5 + $0x1], 0  ;;  %s2533_s21 = smov 0   ;;  %s2535_s22 = smov 0  }
  0x12   :  { %s2537_s23 = smov 0   ;;  %s2539_s24 = smov 0  }
  0x13   :  { %s2541_s25 = smov 0   ;;  %s2543_s26 = smov 0  }
  0x14 LB: > { %3089 = sst [smem:[#allocation22_spill]] %s2427_s21  ;;  %s2564_s27 = sadd.s32 4294967295, %s2447_s26   ;;  %s2447_s26 = sphi %s2543_s26, %s35_s26   ;;  %s2443_s25 = sphi %s2541_s25, %s3138_s25   ;;  %s2439_s24 = sphi %s2539_s24, %s3137_s24   ;;  %s2435_s23 = sphi %s2537_s23, %s3141_s23   ;;  %s2431_s22 = sphi %s2535_s22, %s3140_s22   ;;  %s2427_s21 = sphi %s2533_s21, %s3139_s21  }
  0x15   : > { %3090 = sst [smem:[#allocation23_spill]] %s2439_s24  ;;  %s1819_s28 = sadd.s32 4294967294, %s2447_s26  }
  0x16   : > { %3091 = sst [smem:[#allocation24_spill]] %s2443_s25  ;;  %p69_p0 = scmp.ne.s32.totalorder %s2431_s22, %s2427_s21 }
  0x17   : > { %p3063_p1 = scmp.eq.s32.totalorder %s2564_s27, 0  ;;  %p349_p3 = scmp.eq.s32.totalorder %s1819_s28, 1 }
  0x18   : > { %p1820_p5 = scmp.ge.s32.totalorder %s2447_s26, 1  ;;  %p356_p7 = scmp.lt.s32.totalorder %s2447_s26, 3 }
  0x19   : > { %p2573_p4 = por %p3063_p1, %p69_p0  ;;  %p2578_p6 = por %p349_p3, %p69_p0 }
  0x1a   : > { %p2583_p8 = pnand %p1820_p5, %p356_p7  ;;  %s2449_s14 = smov [#allocation11]  }
  0x1b   : > { %s3092_s29 = scalar_select %p2573_p4, 1, 0 }
  0x1c   : > { %s3093_s30 = scalar_select %p2578_p6, 1, 0 }
  0x1d   : > { %s3095_s13 = scalar_select %p2583_p8, 1, 0 }
  0x1e   : > { %3094 = sst [smem:[#allocation25_spill]] %s3093_s30  ;;  %s368_s15 = sshll.u32 %s2449_s14, 4  ;;  %s2587_s15 = int_to_ptr.vmem [resolvable:$true] %s368_s15 }
  0x1f   : > { %p2032_p9 = pneg %p2583_p8  ;;  %s2450_s17 = smov [#allocation12]  }
  0x20   : > { %s384_s18 = sshll.u32 %s2450_s17, 4  ;;  %s3097_s4 = sld [smem:[#allocation31_spill]]  ;;  %s2598_s18 = int_to_ptr.vmem [resolvable:$true] %s384_s18 }
  0x21   : > { %p2594_p11 = pnand %p2032_p9, %p3063_p1 }
  0x23   : > { %s3096_s16 = scalar_select %p2594_p11, 1, 0 }
  0x24   : > { %p2608_p13 = pneg %p2594_p11 }
  0x26   : > { %s2145_s28 = scalar_lea.hbm %s3097_s4, 512 }
  0x27   : > { %p2146_p12 = scmp.ne.s32.totalorder %s3097_s4, %s2145_s28  ;;  %p2152_p5 = scmp.lt.u32.totalorder %s2145_s28, %s3097_s4 }
  0x28   : > { %s3098_s21 = scalar_select %p2608_p13, 1, 0 }
  0x29   : > { %p2148_p0 = pnand %p2608_p13, %p2146_p12 }
  0x2b   : > { %p2149_p3 = pneg %p2148_p0 }
  0x2d   : > { %p2154_p7 = pnand %p2152_p5, %p2149_p3 }
  0x2f   : > { %2157 = shalt.err (!%p2154_p7)
}
  0x30   : > { %s2158_s30 = scalar_lea.vmem %s2587_s15, 512  ;;  %p2166_p2 = scmp.lt.s32.totalorder %s2587_s15, %s2587_s15 }
  0x31   : > { %p2159_p9 = scmp.ne.s32.totalorder %s2587_s15, %s2158_s30  ;;  %p2167_p6 = scmp.lt.s32.totalorder %s2158_s30, %s2158_s30 }
  0x33   : > { %p2161_p10 = pnand %p2159_p9, %p2608_p13  ;;  %p2168_p12 = por %p2167_p6, %p2166_p2 }
  0x35   : > { %p2162_p1 = pneg %p2161_p10 }
  0x37   : > { %p2169_p0 = pnand %p2168_p12, %p2162_p1 }
  0x39   : > { %2172 = shalt.err (!%p2169_p0)
}
  0x3a   : > { %s3065_s19 = smov 128   ;;  %s3066_s12 = smov 8  }
  0x3b   : > { %2035 = dma.hbm_to_vmem [thread:$0]  (!%p2594_p11), %s3097_s4, 512, %s2587_s15, [#allocation10], %s3065_s19, %s3065_s19, %s3066_s12  }
  0x3c   : > { %s3099_s6 = sld [smem:[#allocation32_spill]] }
  0x42   : > { %s2173_s30 = scalar_lea.hbm %s3099_s6, 512 }
  0x43   : > { %p2174_p1 = scmp.ne.s32.totalorder %s3099_s6, %s2173_s30  ;;  %p2180_p10 = scmp.lt.u32.totalorder %s2173_s30, %s3099_s6 }
  0x45   : > { %p2176_p2 = pnand %p2174_p1, %p2608_p13 }
  0x47   : > { %p2177_p6 = pneg %p2176_p2 }
  0x49   : > { %p2182_p3 = pnand %p2180_p10, %p2177_p6 }
  0x4b   : > { %2185 = shalt.err (!%p2182_p3)
}
  0x4c   : > { %s2186_s15 = scalar_lea.vmem %s2598_s18, 512  ;;  %p2194_p12 = scmp.lt.s32.totalorder %s2598_s18, %s2598_s18 }
  0x4d   : > { %p2187_p5 = scmp.ne.s32.totalorder %s2598_s18, %s2186_s15  ;;  %p2195_p0 = scmp.lt.s32.totalorder %s2186_s15, %s2186_s15 }
  0x4f   : > { %p2189_p7 = pnand %p2187_p5, %p2608_p13  ;;  %p2196_p1 = por %p2195_p0, %p2194_p12 }
  0x51   : > { %p2190_p9 = pneg %p2189_p7 }
  0x53   : > { %p2197_p2 = pnand %p2196_p1, %p2190_p9 }
  0x55   : > { %2200 = shalt.err (!%p2197_p2)
}
  0x56   : > { %2038 = dma.hbm_to_vmem [thread:$0]  (!%p2594_p11), %s3099_s6, 512, %s2598_s18, [#allocation13], %s3065_s19, %s3065_s19, %s3066_s12  }
  0x57   : > { %s47_s11 = sadd.s32 1, %s2443_s25  ;;  %s56_s24 = sadd.s32 1, %s2435_s23 }
  0x58   : > { %p49_p6 = scmp.ge.s32.totalorder %s47_s11, 2  ;;  %p63_p10 = scmp.ne.s32.totalorder %s2435_s23, %s2431_s22 }
  0x59   : > { %p64_p3 = scmp.eq.s32.totalorder %s2447_s26, 0  ;;  %p2062_p5 = scmp.lt.s32.totalorder %s2447_s26, 2 }
  0x5a   : > { %s3143_s11 = smov (%p49_p6, %s47_s11), 0  ;;  %p3101_p9 = scmp.eq.s32.totalorder %s2564_s27, 1 }
  0x5b   : > { %3100 = sst [smem:[#allocation26_spill]] %s3143_s11  ;;  %p65_p7 = por %p64_p3, %p63_p10 }
  0x5c   : > { %p2668_p12 = por %p3101_p9, %p63_p10  ;;  %s51_s28 = ssub.s32 %s2443_s25, %s3143_s11 }
  0x5d   : > { %s3067_s18 = sand.u32 1, %s2435_s23   ;;  %p54_p0 = scmp.eq.s32.totalorder %s51_s28, 0 }
  0x5e   : > { %s3102_s20 = scalar_select %p2668_p12, 1, 0 }
  0x5f   : > { %s2677_s14 = sshll.u32 %s3067_s18, 3  ;;  %s2680_s17 = sshll.u32 %s2443_s25, 7 }
  0x60   : > { %3103 = sst [smem:[#allocation27_spill]] %s3102_s20  ;;  %p2682_p1 = pnand %p2062_p5, %p65_p7 }
  0x61   : > { %s2687_s15 = scalar_select %p54_p0, %s2435_s23, %s56_s24  }
  0x62   : > { %s3104_s30 = scalar_select %p2682_p1, 1, 0 }
  0x63   : > { %3105 = sst [smem:[#allocation28_spill]] %s2687_s15  ;;  %s3072_s9 = sand.u32 1, %s2447_s26  }
  0x64   : > { %s3106_s1 = sld [smem:[#allocation30_spill]]  ;;  %s446_s28 = scalar_lea.vmem [#allocation6], %s2677_s14 }
  0x65   : > { %s453_s18 = sshll.u32 %s446_s28, 4  ;;  %s2701_s4 = scalar_lea.sflag [#allocation7], %s3072_s9  ;;  %s2697_s18 = int_to_ptr.vmem [resolvable:$true] %s453_s18 }
  0x66   : > { %p2707_p6 = pneg %p2682_p1 }
  0x6a   : > { %s2694_s12 = scalar_lea.hbm %s3106_s1, %s2680_s17  ;;  %s2206_s28 = scalar_lea.hbm %s3106_s1, 256 }
  0x6b   : > { %s2201_s6 = scalar_lea.hbm %s2694_s12, 128  ;;  %p2207_p5 = scmp.lt.u32.totalorder %s2694_s12, %s3106_s1 }
  0x6c   : > { %p2202_p2 = scmp.ne.s32.totalorder %s2694_s12, %s2201_s6  ;;  %p2208_p7 = scmp.lt.u32.totalorder %s2206_s28, %s2201_s6 }
  0x6d   : > { %p2210_p0 = scmp.lt.u32.totalorder %s2201_s6, %s2694_s12 }
  0x6e   : > { %p2204_p10 = pnand %p2707_p6, %p2202_p2  ;;  %p2209_p9 = por %p2208_p7, %p2207_p5 }
  0x70   : > { %p2205_p3 = pneg %p2204_p10  ;;  %p2211_p12 = por %p2210_p0, %p2209_p9 }
  0x72   : > { %p2212_p4 = pnand %p2211_p12, %p2205_p3 }
  0x74   : > { %2215 = shalt.err (!%p2212_p4)
}
  0x75   : > { %s2216_s9 = scalar_lea.vmem %s2697_s18, 128  ;;  %s2453_s19 = smov [#allocation6]  }
  0x76   : > { %p2217_p2 = scmp.ne.s32.totalorder %s2697_s18, %s2216_s9  ;;  %s2221_s10 = sshll.u32 %s2453_s19, 4  ;;  %s2222_s10 = int_to_ptr.vmem [resolvable:$false] %s2221_s10 }
  0x77   : > { %s2223_s25 = scalar_lea.vmem %s2222_s10, 256  ;;  %p2224_p11 = scmp.lt.s32.totalorder %s2697_s18, %s2222_s10 }
  0x78   : > { %p2219_p10 = pnand %p2217_p2, %p2707_p6  ;;  %p2225_p13 = scmp.lt.s32.totalorder %s2223_s25, %s2216_s9 }
  0x7a   : > { %p2220_p8 = pneg %p2219_p10  ;;  %p2226_p5 = por %p2225_p13, %p2224_p11 }
  0x7c   : > { %p2227_p7 = pnand %p2226_p5, %p2220_p8 }
  0x7e   : > { %2230 = shalt.err (!%p2227_p7)
}
  0x7f   : > { %2048 = dma.hbm_to_vmem [thread:$0]  (!%p2682_p1), %s2694_s12, 128, %s2697_s18, %s2701_s4  }
  0x80   : > { %s2454_s6 = smov [#allocation14]   ;;  %s3108_s0 = sld [smem:[#allocation29_spill]] }
  0x81   : > { %s400_s11 = sshll.u32 %s2454_s6, 4  ;;  %s2231_s25 = scalar_lea.hbm %s3055_s8, 512  ;;  %s401_s11 = int_to_ptr.vmem [resolvable:$true] %s400_s11 }
  0x82   : > { %p2232_p4 = scmp.ne.s32.totalorder %s3055_s8, %s2231_s25  ;;  %p3109_p8 = scmp.ne.s32.totalorder %s3098_s21, 0 }
  0x83   : > { %p2238_p12 = scmp.lt.u32.totalorder %s2231_s25, %s3055_s8 }
  0x84   : > { %p2234_p11 = pnand %p2232_p4, %p3109_p8 }
  0x86   : > { %s2735_s1 = scalar_lea.hbm %s3108_s0, %s2680_s17  ;;  %p2235_p13 = pneg %p2234_p11 }
  0x88   : > { %p2240_p3 = pnand %p2238_p12, %p2235_p13 }
  0x8a   : > { %2243 = shalt.err (!%p2240_p3)
}
  0x8b   : > { %s2244_s6 = scalar_lea.vmem %s401_s11, 512  ;;  %p2252_p10 = scmp.lt.s32.totalorder %s401_s11, %s401_s11 }
  0x8c   : > { %p2245_p9 = scmp.ne.s32.totalorder %s401_s11, %s2244_s6  ;;  %p2253_p5 = scmp.lt.s32.totalorder %s2244_s6, %s2244_s6 }
  0x8e   : > { %p2247_p0 = pnand %p2245_p9, %p3109_p8  ;;  %p2254_p7 = por %p2253_p5, %p2252_p10 }
  0x90   : > { %p2248_p2 = pneg %p2247_p0 }
  0x92   : > { %p2255_p1 = pnand %p2254_p7, %p2248_p2 }
  0x94   : > { %2258 = shalt.err (!%p2255_p1)
}
  0x95   : > { %p3110_p4 = scmp.ne.s32.totalorder %s3096_s16, 0  ;;  %s3111_s20 = smov 8  }
  0x96   : > { %s3112_s15 = smov 128   ;;  %s427_s21 = scalar_lea.vmem [#allocation3], %s2677_s14 }
  0x97   : > { %2041 = dma.hbm_to_vmem [thread:$0]  (!%p3110_p4), %s3055_s8, 512, %s401_s11, [#allocation13], %s3112_s15, %s3112_s15, %s3111_s20  }
  0x98   : > { %s435_s9 = sshll.u32 %s427_s21, 4  ;;  %s2765_s25 = scalar_lea.hbm %s3049_s2, %s2680_s17  ;;  %s2759_s9 = int_to_ptr.vmem [resolvable:$true] %s435_s9 }
  0x99   : > { %s3113_s12 = sand.u32 1, %s2435_s23   ;;  %s2259_s6 = scalar_lea.hbm %s2735_s1, 128 }
  0x9a   : > { %s424_s18 = scalar_lea.sflag [#allocation4], %s3113_s12  ;;  %p2260_p1 = scmp.ne.s32.totalorder %s2735_s1, %s2259_s6 }
  0x9b   : > { %s2264_s11 = scalar_lea.hbm %s3108_s0, 256  ;;  %p2265_p13 = scmp.lt.u32.totalorder %s2735_s1, %s3108_s0 }
  0x9c   : > { %p2262_p8 = pnand %p2260_p1, %p2707_p6  ;;  %p2266_p12 = scmp.lt.u32.totalorder %s2264_s11, %s2259_s6 }
  0x9d   : > { %p2268_p9 = scmp.lt.u32.totalorder %s2259_s6, %s2735_s1 }
  0x9e   : > { %p2263_p11 = pneg %p2262_p8  ;;  %p2267_p3 = por %p2266_p12, %p2265_p13 }
  0xa0   : > { %p2269_p0 = por %p2268_p9, %p2267_p3 }
  0xa2   : > { %p2270_p2 = pnand %p2269_p0, %p2263_p11 }
  0xa4   : > { %2273 = shalt.err (!%p2270_p2)
}
  0xa5   : > { %s2274_s21 = scalar_lea.vmem %s2759_s9, 128  ;;  %s2455_s16 = smov [#allocation3]  }
  0xa6   : > { %p2275_p10 = scmp.ne.s32.totalorder %s2759_s9, %s2274_s21  ;;  %s2279_s10 = sshll.u32 %s2455_s16, 4  ;;  %s2280_s10 = int_to_ptr.vmem [resolvable:$false] %s2279_s10 }
  0xa7   : > { %s2281_s12 = scalar_lea.vmem %s2280_s10, 256  ;;  %p2282_p4 = scmp.lt.s32.totalorder %s2759_s9, %s2280_s10 }
  0xa8   : > { %p2277_p5 = pnand %p2275_p10, %p2707_p6  ;;  %p2283_p1 = scmp.lt.s32.totalorder %s2281_s12, %s2274_s21 }
  0xaa   : > { %p2278_p7 = pneg %p2277_p5  ;;  %p2284_p8 = por %p2283_p1, %p2282_p4 }
  0xac   : > { %p2285_p13 = pnand %p2284_p8, %p2278_p7 }
  0xae   : > { %2288 = shalt.err (!%p2285_p13)
}
  0xaf   : > { %p3114_p11 = scmp.ne.s32.totalorder %s3104_s30, 0  ;;  %s464_s6 = scalar_lea.vmem [#allocation8], %s2677_s14 }
  0xb0   : > { %s471_s28 = sshll.u32 %s464_s6, 4  ;;  %s2795_s20 = scalar_lea.hbm %s3050_s3, %s2680_s17  ;;  %s472_s28 = int_to_ptr.vmem [resolvable:$true] %s471_s28 }
  0xb1   : > { %2045 = dma.hbm_to_vmem [thread:$0]  (!%p3114_p11), %s2735_s1, 128, %s2759_s9, %s424_s18  }
  0xb2   : > { %s2289_s15 = scalar_lea.hbm %s2765_s25, 128  ;;  %s2294_s10 = scalar_lea.hbm %s3049_s2, 256 }
  0xb3   : > { %p2290_p12 = scmp.ne.s32.totalorder %s2765_s25, %s2289_s15  ;;  %p2295_p0 = scmp.lt.u32.totalorder %s2765_s25, %s3049_s2 }
  0xb4   : > { %p2296_p2 = scmp.lt.u32.totalorder %s2294_s10, %s2289_s15  ;;  %p2298_p5 = scmp.lt.u32.totalorder %s2289_s15, %s2765_s25 }
  0xb5   : > { %p2292_p3 = pnand %p2290_p12, %p2707_p6 }
  0xb6   : > { %p2297_p10 = por %p2296_p2, %p2295_p0 }
  0xb7   : > { %p2293_p9 = pneg %p2292_p3 }
  0xb8   : > { %p2299_p7 = por %p2298_p5, %p2297_p10 }
  0xba   : > { %p2300_p4 = pnand %p2299_p7, %p2293_p9 }
  0xbc   : > { %2303 = shalt.err (!%p2300_p4)
}
  0xbd   : > { %s2304_s1 = scalar_lea.vmem %s472_s28, 128  ;;  %s2456_s17 = smov [#allocation8]  }
  0xbe   : > { %p2305_p1 = scmp.ne.s32.totalorder %s472_s28, %s2304_s1  ;;  %s2309_s9 = sshll.u32 %s2456_s17, 4  ;;  %s2310_s9 = int_to_ptr.vmem [resolvable:$false] %s2309_s9 }
  0xbf   : > { %s2311_s18 = scalar_lea.vmem %s2310_s9, 256  ;;  %p2312_p12 = scmp.lt.s32.totalorder %s472_s28, %s2310_s9 }
  0xc0   : > { %p2307_p8 = pnand %p2305_p1, %p2707_p6  ;;  %p2313_p3 = scmp.lt.s32.totalorder %s2311_s18, %s2304_s1 }
  0xc2   : > { %p2308_p13 = pneg %p2307_p8  ;;  %p2314_p11 = por %p2313_p3, %p2312_p12 }
  0xc4   : > { %p2315_p0 = pnand %p2314_p11, %p2308_p13 }
  0xc6   : > { %2318 = shalt.err (!%p2315_p0)
}
  0xc7   : > { %p3115_p2 = scmp.ne.s32.totalorder %s3104_s30, 0  ;;  %s482_s0 = scalar_lea.vmem [#allocation9], %s2677_s14 }
  0xc8   : > { %s490_s6 = sshll.u32 %s482_s0, 4  ;;  %s3116_s19 = sand.u32 1, %s2447_s26   ;;  %s491_s6 = int_to_ptr.vmem [resolvable:$true] %s490_s6 }
  0xc9   : > { %2051 = dma.hbm_to_vmem [thread:$0]  (!%p3115_p2), %s2765_s25, 128, %s472_s28, %s2701_s4  }
  0xca   : > { %s479_s11 = scalar_lea.sflag [#allocation10], %s3116_s19  ;;  %s2319_s15 = scalar_lea.hbm %s2795_s20, 128 }
  0xcb   : > { %p2320_p11 = scmp.ne.s32.totalorder %s2795_s20, %s2319_s15  ;;  %s2324_s10 = scalar_lea.hbm %s3050_s3, 256 }
  0xcc   : > { %p2325_p5 = scmp.lt.u32.totalorder %s2795_s20, %s3050_s3  ;;  %p2326_p7 = scmp.lt.u32.totalorder %s2324_s10, %s2319_s15 }
  0xcd   : > { %p2322_p9 = pnand %p2320_p11, %p2707_p6  ;;  %p2328_p1 = scmp.lt.u32.totalorder %s2319_s15, %s2795_s20 }
  0xce   : > { %p2327_p4 = por %p2326_p7, %p2325_p5 }
  0xcf   : > { %p2323_p10 = pneg %p2322_p9 }
  0xd0   : > { %p2329_p8 = por %p2328_p1, %p2327_p4 }
  0xd2   : > { %p2330_p13 = pnand %p2329_p8, %p2323_p10 }
  0xd4   : > { %2333 = shalt.err (!%p2330_p13)
}
  0xd5   : > { %s2334_s4 = scalar_lea.vmem %s491_s6, 128  ;;  %s2457_s14 = smov [#allocation9]  }
  0xd6   : > { %p2335_p12 = scmp.ne.s32.totalorder %s491_s6, %s2334_s4  ;;  %s2339_s25 = sshll.u32 %s2457_s14, 4  ;;  %s2340_s25 = int_to_ptr.vmem [resolvable:$false] %s2339_s25 }
  0xd7   : > { %s2341_s28 = scalar_lea.vmem %s2340_s25, 256  ;;  %p2342_p11 = scmp.lt.s32.totalorder %s491_s6, %s2340_s25 }
  0xd8   : > { %p2337_p3 = pnand %p2335_p12, %p2707_p6  ;;  %p2343_p9 = scmp.lt.s32.totalorder %s2341_s28, %s2334_s4 }
  0xda   : > { %p2338_p0 = pneg %p2337_p3  ;;  %p2344_p2 = por %p2343_p9, %p2342_p11 }
  0xdc   : > { %p2345_p5 = pnand %p2344_p2, %p2338_p0 }
  0xde   : > { %2348 = shalt.err (!%p2345_p5)
}
  0xdf   : > { %p3117_p7 = scmp.ne.s32.totalorder %s3104_s30, 0  ;;  %p3118_p10 = scmp.ne.s32.totalorder %s3095_s13, 0 }
  0xe0   : > { %s2838_s24 = sand.u32 (!%p3118_p10), 1, %s2431_s22   ;;  %p3119_p6 = scmp.ne.s32.totalorder (!%p3118_p10), %s3092_s29, 0 }
  0xe1   : > { %2054 = dma.hbm_to_vmem [thread:$0]  (!%p3117_p7), %s2795_s20, 128, %s491_s6, %s479_s11  }
  0xe2   : > { %499 = sbr.rel (%p3118_p10) target bundleno = 2163 (0x873), region = 68  ;;  %s2841_s17 = sshll.u32 (!%p3118_p10), %s2838_s24, 3 }
  0xe3   : > { %s502_s9 = scalar_lea.sflag (!%p3118_p10), [#allocation4], %s2838_s24  ;;  %s505_s18 = scalar_lea.vmem (!%p3118_p10), [#allocation3], %s2841_s17 }
  0xe9   : > { %2402 = dma.done.wait (%p3119_p6), %s502_s9, 128  }
  0xea   : > { %2404 = vsyncadd (%p3119_p6), %s502_s9, 4294967168  ;;  %s510_s13 = sand.u32 1, %s2564_s27   ;;  %s514_s20 = scalar_lea.vmem [#allocation6], %s2841_s17 }
  0xeb   : > { %s511_s30 = scalar_lea.sflag [#allocation7], %s510_s13 }
  0xec   : > { %2406 = dma.done.wait (%p3119_p6), %s511_s30, 256  }
  0xed   : > { %2408 = vsyncadd (%p3119_p6), %s511_s30, 4294967040  ;;  %s523_s0 = scalar_lea.vmem [#allocation8], %s2841_s17  ;;  %s529_s6 = scalar_lea.sflag [#allocation10], %s510_s13 }
  0xee   : > { %s532_s19 = scalar_lea.vmem [#allocation9], %s2841_s17 }
  0xef   : > { %2410 = dma.done.wait (%p3119_p6), %s529_s6, 128  }
  0xf0   : > { %2412 = vsyncadd (%p3119_p6), %s529_s6, 4294967168  ;;  %p3120_p2 = scmp.eq.s32.totalorder %s2564_s27, 0 }
  0xf2   : > { %2414 = dma.done.wait (%p3120_p2), [#allocation10], 512   ;;  %p3121_p4 = pmov %p3120_p2 }
  0xf3   : > { %p3122_p1 = pmov %p3120_p2 }
  0xf4   : > { %2416 = vsyncadd (%p3121_p4), [#allocation10], 4294966784 }
  0xf5   : > { %2418 = dma.done.wait (%p3122_p1), [#allocation13], 1024   ;;  %p3123_p8 = pmov %p3122_p1 }
  0xf6   : > { %v2458_v0 = vmov 0.0|0.0   ;;  %vm2459_vm0 = vmmov 0   ;;  %v2460_v1 = vmov 0.0   ;;  %v689_v2 = vld [vmem:[#allocation12] sm:$0xff]  ;;  %v690_v3 = vld [vmem:[#allocation12 + $0x8] sm:$0xff]  ;;  %v691_v7 = vld [vmem:[#allocation12 + $0x10] sm:$0xff] }
  0xf7   : > { %2420 = vsyncadd (%p3123_p8), [#allocation13], 4294966272  ;;  %1992 = vmatprep.subr.bf16.mxu1 %v2458_v0  ;;  %1986 = vmatprep.subr.bf16.mxu0 %v2458_v0  ;;  %v604_v4 = vld [vmem:[#allocation11] sm:$0xff]  ;;  %v1993_v5 = vpack.c.bf16 %v690_v3, %v689_v2  ;;  %v605_v6 = vld [vmem:[#allocation11 + $0x8] sm:$0xff]  ;;  %vm615_vm1 = vcmask 261120   ;;  %vm857_vm2 = vcmask 64512  }
  0xf8   : > { %1921 = vmatprep.mubr.msk.f32.mxu1 %vm2459_vm0, %v2460_v1  ;;  %1910 = vmatprep.mubr.msk.f32.mxu0 %vm2459_vm0, %v2460_v1  ;;  %v692_v8 = vld [vmem:[#allocation12 + $0x18] sm:$0xff]  ;;  %v1987_v9 = vpack.c.bf16 %v605_v6, %v604_v4  ;;  %v606_v10 = vld [vmem:[#allocation11 + $0x10] sm:$0xff]  ;;  %v600_v15 = vld [vmem:[%s505_s18] sm:$0xff]  ;;  %s2461_s21 = smov 120   ;;  %s2462_s16 = smov 112   ;;  %vm1194_vm4 = vcmask 130112  }
  0xf9   : > { %v607_v11 = vld [vmem:[#allocation11 + $0x18] sm:$0xff]  ;;  %1994 = vmatpush3.bf16.msra.mxu1 %v1993_v5  ;;  %v1996_v12 = vpack.c.bf16 %v692_v8, %v691_v7  ;;  %s2463_s10 = smov 104   ;;  %v773_v24 = vld [vmem:[#allocation14] sm:$0xff]  ;;  %v774_v25 = vld [vmem:[#allocation14 + $0x8] sm:$0xff]  ;;  %s3124_s4 = sld [smem:[#allocation33_spill]]  ;;  %vm1367_vm5 = vcmask 195712  }
  0xfa   : > { %1988 = vmatpush3.bf16.msra.mxu0 %v1987_v9  ;;  %1995 = vmatprep.subr.bf16.mxu1 %v2458_v0  ;;  %v1990_v13 = vpack.c.bf16 %v607_v11, %v606_v10  ;;  %v601_v14 = vld [vmem:[%s514_s20] sm:$0xff]  ;;  %v1999_v27 = vpack.c.bf16 %v774_v25, %v773_v24  ;;  %v602_v30 = vld [vmem:[%s523_s0] sm:$0xff]  ;;  %s3125_s28 = sld [smem:[#allocation34_spill]]  ;;  %s2464_s6 = smov 8   ;;  %vm1540_vm6 = vcmask 261312  }
  0xfb   : > { %1989 = vmatprep.subr.bf16.mxu0 %v2458_v0  ;;  %v1844_v16 = vld [vmem:[%s3054_s7] ss:$0 sm:$0xff]  ;;  %v775_v26 = vld [vmem:[#allocation14 + $0x10] sm:$0xff]  ;;  %s3126_s27 = sld [smem:[#allocation23_spill]]  ;;  %s2466_s29 = smov 24  }
  0xfc   : > { %v1842_v17 = vld [vmem:[%s3052_s5] ss:$0 sm:$0xff]  ;;  %s3127_s11 = sld [smem:[#allocation27_spill]]  ;;  %s599_s12 = scalar_lea.vmem [#allocation15], %s2841_s17 }
  0xfd   : > { %1997 = vmatpush3.bf16.msra.mxu1 %v1996_v12  ;;  %v776_v28 = vld [vmem:[#allocation14 + $0x18] sm:$0xff]  ;;  %s1643_s1 = sshll.u32 %s599_s12, 4  ;;  %s3129_s25 = sld [smem:[#allocation36_spill]]  ;;  %s2999_s1 = int_to_ptr.vmem [resolvable:$true] %s1643_s1 }
  0xfe   : > { %1991 = vmatpush3.bf16.msra.mxu0 %v1990_v13  ;;  %1935 = vmatprep.subr.mxu1 %v2460_v1  ;;  %v2002_v29 = vpack.c.bf16 %v776_v28, %v775_v26  ;;  %v2914_v31 = vld [vmem:[%s532_s19] sm:$0xff]  ;;  %s2465_s19 = smov 16   ;;  %s1629_s13 = scalar_lea.sflag [#allocation5], %s2838_s24 }
  0xff   : > { %1998 = vmatprep.subr.bf16.mxu0 %v2458_v0  ;;  %vm935_vm3 = vcmp.eq.f32.partialorder %v2914_v31, 0.0  ;;  %v1846_v42 = vld [vmem:[%s3124_s4] ss:$0 sm:$0xff]  ;;  %s2349_s30 = scalar_lea.vmem %s2999_s1, 128  ;;  %s2467_s17 = smov [#allocation15]  }
 0x100   : > { %1922 = vmatmul.mubr.msk.f32.vlgmr.msra.gmra.mrb[0].mxu1 %vm615_vm1, %v601_v14  ;;  %p2350_p13 = scmp.ne.s32.totalorder %s2999_s1, %s2349_s30  ;;  %s2353_s20 = sshll.u32 %s2467_s17, 4  ;;  %s2354_s20 = int_to_ptr.vmem [resolvable:$false] %s2353_s20 }
 0x101   : > { %1911 = vmatmul.mubr.msk.f32.vlgmr.msra.gmra.mrb[0].mxu0 %vm615_vm1, %v600_v15  ;;  %1937 = vmatprep.mubr.msk.f32.mxu1 %vm2459_vm0, %v2460_v1  ;;  %s2355_s0 = scalar_lea.vmem %s2354_s20, 256  ;;  %p2356_p11 = scmp.lt.s32.totalorder %s2999_s1, %s2354_s20 }
 0x102   : > { %1932 = vmatprep.mubr.msk.f32.mxu0 %vm2459_vm0, %v2460_v1  ;;  %2000 = vmatpush3.bf16.msra.mxu0 %v1999_v27  ;;  %p3131_p12 = scmp.ne.s32.totalorder %s3127_s11, 0  ;;  %p2357_p9 = scmp.lt.s32.totalorder %s2355_s0, %s2349_s30 }
 0x103   : > { %2001 = vmatprep.subr.bf16.mxu0 %v2458_v0  ;;  %s3130_s9 = smov %s3129_s25 }
 0x104   : > { %p2351_p3 = pnand %p2350_p13, %p3131_p12  ;;  %p2358_p5 = por %p2357_p9, %p2356_p11 }
 0x106   : > { %2003 = vmatpush3.bf16.msra.mxu0 %v2002_v29  ;;  %p2352_p0 = pneg %p2351_p3 }
 0x107   : > { %1955 = vmatprep.subr.mxu0 %v2460_v1 }
 0x108   : > { %p2359_p7 = pnand %p2358_p5, %p2352_p0 }
 0x109   : > { %1933 = vmatmul.mubr.msk.f32.vlgmr.msra.gmra.mrb[2].mxu0 %vm615_vm1, %v602_v30 }
 0x10a   : > { %1957 = vmatprep.mubr.msk.f32.mxu0 %vm2459_vm0, %v2460_v1 }
 0x1d3   : > { %v769_v18 = vpop.f32.mrb[0].mxu1 }
 0x1d4   : > { %v770_v19 = vadd.f32 %v1844_v16, %v769_v18  ;;  %v1923_v20 = vpop.f32.mrb[1].mxu1  ;;  %v685_v21 = vpop.f32.mrb[0].mxu0 }
 0x1d5   : > { %v686_v22 = vadd.f32 %v1842_v17, %v685_v21  ;;  %v1912_v23 = vpop.f32.mrb[1].mxu0 }
 0x1d6   : > { %1024 = vrot.lane.b32.xlu1 %v770_v19, %s2461_s21  ;;  %1936 = vmatpush3.xpose.msk.msra.mxu1 %vm857_vm2, %v770_v19 }
 0x1d7   : > { %1940 = vmatprep.subr.mxu1 %v2460_v1 }
 0x1d9   : > { %1938 = vmatmul.mubr.msk.f32.vlgmr.msra.gmra.mrb[2].mxu1 %vm857_vm2, %v686_v22 }
 0x1da   : > { %1022 = vrot.lane.b32.xlu1 %v686_v22, %s2461_s21  ;;  %1942 = vmatprep.mubr.msk.f32.mxu1 %vm2459_vm0, %v2460_v1 }
 0x1dc   : > { %v853_v43 = vpop.f32.mrb[2].mxu0 }
 0x1dd   : > { %v2924_v44 = vadd.f32 %v1846_v42, %v853_v43  ;;  %v1934_v45 = vpop.f32.mrb[3].mxu0 }
 0x1de   : > { %1196 = vrot.lane.b32.xlu1 %v686_v22, %s2462_s16 }
 0x1df   : > { %1941 = vmatpush3.msra.mxu1 %v2924_v44 }
 0x1e0   : > { %1945 = vmatprep.subr.mxu1 %v2460_v1 }
 0x1e2   : > { %1371 = vrot.lane.b32.xlu1 %v770_v19, %s2463_s10 }
 0x1e6   : > { %1369 = vrot.lane.b32.xlu1 %v686_v22, %s2463_s10 }
 0x248   : > { %v1025_v46 = vpop.permute.xlu1 %1024 }
 0x24c   : > { %v1023_v47 = vpop.permute.xlu1 %1022 }
 0x250   : > { %v1197_v48 = vpop.permute.xlu1 %1196 }
 0x254   : > { %v1372_v51 = vpop.permute.xlu1 %1371 }
 0x258   : > { %v1370_v53 = vpop.permute.xlu1 %1369 }
 0x2ac   : > { %v930_v32 = vpop.f32.mrb[2].mxu1 }
 0x2ad   : > { %v934_v33 = vmul.f32 0.35355338, %v930_v32  ;;  %v1939_v34 = vpop.f32.mrb[3].mxu1 }
 0x2af   : > { %v936_v35 = vsel %vm935_vm3, -1e+09, %v934_v33 }
 0x2b0   : > { %v937_v36 = vsel %vm857_vm2, %v936_v35, -inf }
 0x2b1   : > { %938 = vmax.xlane.f32.xlu0 %v937_v36 }
 0x33e   : > { %v939_v37 = vpop.xlane.xlu0 %938 }
 0x33f   : > { %v940_v38 = vsub.f32 %v936_v35, %v939_v37  ;;  %v1543_v37 = vld [vmem:[%s3125_s28] sm:$0xff] }
 0x341   : > { %v941_v39 = vmul.f32 1.442695, %v940_v38  ;;  %v1544_v38 = vld [vmem:[%s3125_s28 + $0x8] sm:$0xff] }
 0x343   : > { %2129 = vpow2.f32 %v941_v39  ;;  %v2005_v39 = vpack.c.bf16 %v1544_v38, %v1543_v37 }
 0x34d   : > { %v2130_v40 = vpop.eup %2129 }
 0x34e   : > { %v943_v41 = vsel %vm857_vm2, %v2130_v40, 0.0 }
 0x34f   : > { %944 = vadd.xlane.f32.xlu0 %v943_v41 }
 0x365   : > { %1198 = vrot.lane.b32.xlu0 %v770_v19, %s2462_s16 }
 0x3dc   : > { %v945_v49 = vpop.xlane.xlu0 %944 }
 0x3dd   : > { %2131 = vrcp.f32 %v945_v49 }
 0x3e0   : > { %v1199_v50 = vpop.permute.xlu0 %1198 }
 0x3e1   : > { %1956 = vmatpush3.xpose.msk.msra.mxu0 %vm857_vm2, %v1199_v50 }
 0x3e2   : > { %1965 = vmatprep.subr.mxu0 %v2460_v1 }
 0x3e4   : > { %1958 = vmatmul.mubr.msk.f32.vlgmr.msra.gmra.mrb[4].mxu0 %vm857_vm2, %v1197_v48 }
 0x3e5   : > { %1966 = vmatpush3.xpose.msk.msra.mxu0 %vm857_vm2, %v1372_v51  ;;  %1967 = vmatprep.mubr.msk.f32.mxu0 %vm2459_vm0, %v2460_v1 }
 0x3e6   : > { %2004 = vmatprep.subr.bf16.mxu0 %v2458_v0 }
 0x3e7   : > { %v2132_v52 = vpop.eup %2131 }
 0x3e8   : > { %v947_v54 = vmul.f32 %v2132_v52, %v2130_v40  ;;  %1968 = vmatmul.mubr.msk.f32.vlgmr.msra.gmra.mrb[6].mxu0 %vm857_vm2, %v1370_v53  ;;  %v1545_v40 = vld [vmem:[%s3125_s28 + $0x10] sm:$0xff] }
 0x3e9   : > { %1983 = vmatprep.mubr.msk.f32.mxu0 %vm2459_vm0, %v2460_v1  ;;  %2006 = vmatpush3.bf16.msra.mxu0 %v2005_v39 }
 0x3ea   : > { %1943 = vmatmul.mubr.msk.f32.vlgmr.msra.gmra.mrb[4].mxu1 %vm857_vm2, %v947_v54  ;;  %2007 = vmatprep.subr.bf16.mxu0 %v2458_v0 }
 0x3eb   : > { %1946 = vmatpush3.xpose.msk.msra.mxu1 %vm857_vm2, %v1025_v46  ;;  %1947 = vmatprep.mubr.msk.f32.mxu1 %vm2459_vm0, %v2460_v1 }
 0x3ec   : > { %1950 = vmatprep.subr.mxu1 %v2460_v1 }
 0x3ee   : > { %1948 = vmatmul.mubr.msk.f32.vlgmr.msra.gmra.mrb[6].mxu1 %vm857_vm2, %v1023_v47 }
 0x3ef   : > { %1952 = vmatprep.mubr.msk.f32.mxu1 %vm2459_vm0, %v2460_v1 }
 0x4b7   : > { %v1270_v55 = vpop.f32.mrb[4].mxu0 }
 0x4b8   : > { %v1274_v56 = vmul.f32 0.35355338, %v1270_v55  ;;  %v1959_v57 = vpop.f32.mrb[5].mxu0 }
 0x4ba   : > { %v1275_v58 = vsel %vm935_vm3, -1e+09, %v1274_v56 }
 0x4bb   : > { %v1443_v59 = vpop.f32.mrb[6].mxu0  ;;  %v1276_v60 = vsel %vm857_vm2, %v1275_v58, -inf }
 0x4bc   : > { %1277 = vmax.xlane.f32.xlu0 %v1276_v60  ;;  %v1969_v61 = vpop.f32.mrb[7].mxu0  ;;  %v1447_v3 = vmul.f32 0.35355338, %v1443_v59 }
 0x4bd   : > { %v1017_v62 = vpop.f32.mrb[4].mxu1 }
 0x4be   : > { %1021 = vst.msk [vmem:[#allocation2] sm:$0xff] %vm857_vm2, %v1017_v62  ;;  %v1944_v63 = vpop.f32.mrb[5].mxu1  ;;  %v1448_v8 = vsel %vm935_vm3, -1e+09, %v1447_v3 }
 0x4bf   : > { %v1449_v9 = vsel %vm857_vm2, %v1448_v8, -inf }
 0x4c1   : > { %v1096_v2 = vpop.f32.mrb[6].mxu1 }
 0x4c2   : > { %v1100_v4 = vmul.f32 0.35355338, %v1096_v2  ;;  %v1949_v5 = vpop.f32.mrb[7].mxu1 }
 0x4c4   : > { %v1101_v6 = vsel %vm935_vm3, -1e+09, %v1100_v4 }
 0x4c5   : > { %v1102_v7 = vsel %vm857_vm2, %v1101_v6, -inf }
 0x4c6   : > { %1103 = vmax.xlane.f32.xlu1 %v1102_v7 }
 0x4ca   : > { %1450 = vmax.xlane.f32.xlu1 %v1449_v9 }
 0x549   : > { %v1278_v10 = vpop.xlane.xlu0 %1277 }
 0x54a   : > { %v1279_v11 = vsub.f32 %v1275_v58, %v1278_v10 }
 0x54c   : > { %v1280_v12 = vmul.f32 1.442695, %v1279_v11 }
 0x54e   : > { %2133 = vpow2.f32 %v1280_v12 }
 0x553   : > { %v1104_v13 = vpop.xlane.xlu1 %1103 }
 0x554   : > { %v1105_v21 = vsub.f32 %v1101_v6, %v1104_v13 }
 0x556   : > { %v1106_v22 = vmul.f32 1.442695, %v1105_v21 }
 0x557   : > { %v1451_v14 = vpop.xlane.xlu1 %1450 }
 0x558   : > { %v2134_v15 = vpop.eup %2133  ;;  %v1452_v16 = vsub.f32 %v1448_v8, %v1451_v14 }
 0x559   : > { %v1282_v17 = vsel %vm857_vm2, %v2134_v15, 0.0 }
 0x55a   : > { %v1453_v18 = vmul.f32 1.442695, %v1452_v16  ;;  %1283 = vadd.xlane.f32.xlu0 %v1282_v17 }
 0x55c   : > { %2135 = vpow2.f32 %v1453_v18 }
 0x55d   : > { %2137 = vpow2.f32 %v1106_v22 }
 0x566   : > { %v2136_v19 = vpop.eup %2135 }
 0x567   : > { %v1455_v20 = vsel %vm857_vm2, %v2136_v19, 0.0  ;;  %v2138_v23 = vpop.eup %2137 }
 0x568   : > { %1456 = vadd.xlane.f32.xlu1 %v1455_v20  ;;  %v1108_v24 = vsel %vm857_vm2, %v2138_v23, 0.0 }
 0x570   : > { %1114 = vrot.lane.b32.xlu0 %v2924_v44, %s2461_s21 }
 0x579   : > { %1287 = vrot.lane.b32.xlu1 %v2924_v44, %s2462_s16  ;;  %s3128_s16 = sld [smem:[#allocation35_spill]] }
 0x57f   : > { %v1860_v51 = vld [vmem:[%s3128_s16] ss:$0 sm:$0xff] }
 0x59d   : > { %1109 = vadd.xlane.f32.xlu1 %v1108_v24 }
 0x5ae   : > { %1460 = vrot.lane.b32.xlu1 %v2924_v44, %s2463_s10  ;;  %s1863_s10 = sshll.u32 %s3126_s27, 7 }
 0x5af   : > { %s2997_s18 = scalar_lea.hbm %s3129_s25, %s1863_s10 }
 0x5e7   : > { %v1284_v25 = vpop.xlane.xlu0 %1283 }
 0x5eb   : > { %v1115_v26 = vpop.permute.xlu0 %1114 }
 0x5ec   : > { %1951 = vmatpush3.msra.mxu1 %v1115_v26 }
 0x5ed   : > { %1960 = vmatprep.subr.mxu1 %v2460_v1 }
 0x5f5   : > { %v1457_v27 = vpop.xlane.xlu1 %1456 }
 0x5f9   : > { %v1288_v28 = vpop.permute.xlu1 %1287 }
 0x62a   : > { %v1110_v29 = vpop.xlane.xlu1 %1109 }
 0x62b   : > { %2139 = vrcp.f32 %v1110_v29 }
 0x62c   : > { %2141 = vrcp.f32 %v1284_v25 }
 0x62d   : > { %2143 = vrcp.f32 %v1457_v27 }
 0x62e   : > { %v1461_v35 = vpop.permute.xlu1 %1460 }
 0x635   : > { %v2140_v30 = vpop.eup %2139 }
 0x636   : > { %v1112_v31 = vmul.f32 %v2140_v30, %v2138_v23  ;;  %v2142_v32 = vpop.eup %2141 }
 0x637   : > { %v1286_v33 = vmul.f32 %v2142_v32, %v2134_v15  ;;  %v2144_v34 = vpop.eup %2143 }
 0x638   : > { %1953 = vmatmul.mubr.msk.f32.vlgmr.msra.gmra.mrb[8].mxu1 %vm857_vm2, %v1112_v31  ;;  %v1459_v36 = vmul.f32 %v2144_v34, %v2136_v19 }
 0x639   : > { %1961 = vmatpush3.msra.mxu1 %v1288_v28  ;;  %1962 = vmatprep.mubr.msk.f32.mxu1 %vm2459_vm0, %v2460_v1 }
 0x63a   : > { %1970 = vmatprep.subr.mxu1 %v2460_v1 }
 0x63c   : > { %1963 = vmatmul.mubr.msk.f32.vlgmr.msra.gmra.mrb[10].mxu1 %vm857_vm2, %v1286_v33 }
 0x63d   : > { %1971 = vmatpush3.msra.mxu1 %v1461_v35  ;;  %1972 = vmatprep.mubr.msk.f32.mxu1 %vm2459_vm0, %v2460_v1  ;;  %v1546_v1 = vld [vmem:[%s3125_s28 + $0x18] sm:$0xff] }
 0x63e   : > { %v2008_v41 = vpack.c.bf16 %v1546_v1, %v1545_v40 }
 0x640   : > { %1973 = vmatmul.mubr.msk.f32.vlgmr.msra.gmra.mrb[12].mxu1 %vm857_vm2, %v1459_v36  ;;  %2009 = vmatpush3.bf16.msra.mxu0 %v2008_v41 }
 0x70b   : > { %v1186_v42 = vpop.f32.mrb[8].mxu1 }
 0x70c   : > { %1191 = vrot.lane.b32.xlu0 %v1186_v42, %s2464_s6  ;;  %v1954_v43 = vpop.f32.mrb[9].mxu1 }
 0x70f   : > { %v1359_v44 = vpop.f32.mrb[10].mxu1 }
 0x710   : > { %1364 = vrot.lane.b32.xlu1 %v1359_v44, %s2465_s19  ;;  %v1964_v45 = vpop.f32.mrb[11].mxu1 }
 0x713   : > { %v1532_v46 = vpop.f32.mrb[12].mxu1 }
 0x714   : > { %1537 = vrot.lane.b32.xlu0 %v1532_v46, %s2466_s29  ;;  %v1974_v47 = vpop.f32.mrb[13].mxu1 }
 0x77e   : > { %v1192_v48 = vpop.permute.xlu0 %1191 }
 0x77f   : > { %1195 = vst.msk [vmem:[#allocation2] sm:$0xff] %vm1194_vm4, %v1192_v48 }
 0x782   : > { %v1365_v0 = vpop.permute.xlu1 %1364 }
 0x783   : > { %1368 = vst.msk [vmem:[#allocation2] sm:$0xff] %vm1367_vm5, %v1365_v0 }
 0x786   : > { %v1538_v49 = vpop.permute.xlu0 %1537 }
 0x787   : > { %1541 = vst.msk [vmem:[#allocation2] sm:$0xff] %vm1540_vm6, %v1538_v49 }
 0x78e   : > { %v1542_v50 = vld [vmem:[#allocation2] sm:$0xff] }
 0x78f   : > { %1984 = vmatmul.mubr.msk.f32.vlgmr.msra.gmra.mrb[8].mxu0 %vm615_vm1, %v1542_v50 }
 0x862   : > { %v1623_v52 = vpop.f32.mrb[8].mxu0 }
 0x863   : > { %v1624_v53 = vadd.f32 %v1860_v51, %v1623_v52  ;;  %v1985_v54 = vpop.f32.mrb[9].mxu0 }
 0x865   : > { %1627 = vst.msk [vmem:[%s599_s12] sm:$0xff] %vm615_vm1, %v1624_v53 }
 0x866   : > { %2362 = shalt.err (!%p2359_p7)
}
 0x867   : > { %s2363_s24 = scalar_lea.hbm %s2997_s18, 128  ;;  %s2367_s27 = scalar_lea.hbm %s3130_s9, 256 }
 0x868   : > { %p2364_p10 = scmp.ne.s32.totalorder %s2997_s18, %s2363_s24  ;;  %p2368_p4 = scmp.lt.u32.totalorder %s2997_s18, %s3130_s9 }
 0x869   : > { %p2369_p1 = scmp.lt.u32.totalorder %s2367_s27, %s2363_s24  ;;  %p2371_p13 = scmp.lt.u32.totalorder %s2363_s24, %s2997_s18 }
 0x86a   : > { %p2365_p6 = pnand %p2364_p10, %p3131_p12 }
 0x86b   : > { %p2370_p8 = por %p2369_p1, %p2368_p4 }
 0x86c   : > { %p2366_p2 = pneg %p2365_p6 }
 0x86d   : > { %p2372_p3 = por %p2371_p13, %p2370_p8 }
 0x86f   : > { %p2373_p0 = pnand %p2372_p3, %p2366_p2 }
 0x871   : > { %2376 = shalt.err (!%p2373_p0)
}
 0x872   : > { %2030 = dma.vmem_to_hbm [thread:$0]  (%p3131_p12), %s2999_s1, 128, %s2997_s18, %s1629_s13  }
 0x873 PF: > { %s3132_s21 = sld [smem:[#allocation22_spill]]  ;;  %s3133_s16 = sld [smem:[#allocation25_spill]] }
 0x874   : > { %p3135_p9 = scmp.ge.s32.totalorder %s2447_s26, 2 }
 0x879   : > { %s1655_s10 = sand.u32 1, %s3132_s21   ;;  %p3134_p11 = scmp.ne.s32.totalorder %s3133_s16, 0 }
 0x87a   : > { %s1656_s12 = scalar_lea.sflag [#allocation5], %s1655_s10 }
 0x87b   : > { %p2056_p5 = pnand %p3135_p9, %p3134_p11 }
 0x87d   : > { %2422 = dma.done.wait (!%p2056_p5), %s1656_s12, 128  }
 0x87e   : > { %2424 = vsyncadd (!%p2056_p5), %s1656_s12, 4294967168  ;;  %s35_s26 = sadd.s32 1, %s2447_s26   ;;  %s3136_s11 = sld [smem:[#allocation28_spill]] }
 0x87f   : > { %p32_p7 = scmp.ge.s32.totalorder %s35_s26, 4   ;;  %s3137_s24 = sld [smem:[#allocation24_spill]] }
 0x880   : > { %s3138_s25 = sld [smem:[#allocation26_spill]]  ;;  %s3139_s21 = smov %s2431_s22 }
 0x881   : > { %s3140_s22 = smov %s2435_s23  ;;  %34 = sbr.rel (!%p32_p7) target bundleno = 20 (0x14), region = 162 }
 0x884   : > { %s3141_s23 = smov %s3136_s11 }
 0x888   :  { %1661 = vsyncpa [#allocation4], 1 }
 0x889   :  { %1663 = vsyncpa [#allocation4 + $0x1], 1 }
 0x88a   :  { %1664 = vsyncpa [#allocation7], 1 }
 0x88b   :  { %1666 = vsyncpa [#allocation7 + $0x1], 1 }
 0x88c   :  { %1667 = vsyncpa [#allocation10], 1 }
 0x88d   :  { %1669 = vsyncpa [#allocation10 + $0x1], 1 }
 0x88e   :  { %1670 = vsyncpa [#allocation13], 1 }
 0x88f   :  { %1671 = vsyncpa [#allocation5], 1 }
 0x890   :  { %1673 = vsyncpa [#allocation5 + $0x1], 1 }

</bundles_post_ra>
